<compile_context>
chip_gen: v7x
topology: tpu7x:2x2x1
jax: 0.10.0
libtpu: 0.0.40
codegen_flags: <defaults>
</compile_context>

<pallas_src>
import functools

import numpy as np
import jax
import jax.numpy as jnp
from jax.experimental import pallas as pl
from jax.experimental.pallas import tpu as pltpu


def _make_kernel(H, W, C_in, C_out, Nb):
    HW = H * W
    # Tap order must match the weight reshape: t = dy*3 + dx, shift = (dy-1, dx-1).
    shifts = [(dy - 1, dx - 1) for dy in range(3) for dx in range(3)]

    def kernel(x_ref, w_ref, m_ref, bm_ref, keep_ref, o_ref, xw_ref, col_ref):
        # x_ref   : (Nb, C_in, H*W)   NCHW input, spatial flattened
        # w_ref   : (C_out, 9*C_in)   conv weights, K ordered as (dy, dx, c_in)
        # m_ref   : (C_out, 1)        exp(3*scale)
        # bm_ref  : (C_out, 1)        bias * exp(3*scale)
        # keep_ref: (9, 1, H*W)       1.0 where a tap reads inside the image,
        #                             0.0 where it reads the constant-1 border
        # o_ref   : (Nb, C_out, H*W)
        # xw_ref  : VMEM (C_in, 2*H*W) image replicated twice (shift via slices)
        # col_ref : VMEM (9*C_in, H*W) im2col matrix
        w = w_ref[...]
        m = m_ref[...]        # (C_out, 1)
        bm = bm_ref[...]      # (C_out, 1)

        for b in range(Nb):
            x_flat = x_ref[b]                       # (C_in, HW)
            # Doubled copy: every shifted window below is an in-bounds slice.
            xw_ref[:, 0:HW] = x_flat
            xw_ref[:, HW:2 * HW] = x_flat

            for t, (sy, sx) in enumerate(shifts):
                off = (sy * W + sx) % HW            # static python int in [0, HW)
                shifted = xw_ref[:, off:off + HW]   # (C_in, HW): image rolled by (sy, sx)
                keep = keep_ref[t]                  # (1, HW)
                # Interior positions take the shifted image, border positions take
                # the pad value 1.0 (garbage wrap values are masked out by keep=0).
                col_ref[t * C_in:(t + 1) * C_in, :] = shifted * keep + (1.0 - keep)

            # Single fused MXU matmul over K = 9*C_in; lane-dense (C_out, HW) result.
            acc = jnp.dot(w, col_ref[...], preferred_element_type=jnp.float32)
            o_ref[b] = (acc * m + bm).astype(o_ref.dtype)

    return kernel


def _border_keep_masks(H, W):
    """keep[t, 0, p] = 1.0 iff tap t at flat position p = h*W + w reads inside the image."""
    hh, ww = np.meshgrid(np.arange(H), np.arange(W), indexing="ij")
    keeps = []
    for dy in range(3):
        for dx in range(3):
            sy, sx = dy - 1, dx - 1
            valid = ((hh + sy >= 0) & (hh + sy < H) &
                     (ww + sx >= 0) & (ww + sx < W))
            keeps.append(valid.reshape(-1))
    return np.stack(keeps, 0).astype(np.float32).reshape(9, 1, H * W)


@functools.partial(jax.jit, static_argnames=("batch_block",))
def zero_conv2d(x_nchw, weight_oihw, bias, scale, *, batch_block=1):
    """ZeroConv2d forward.

    x_nchw     : (N, C_in, H, W) float32
    weight_oihw: (C_out, C_in, 3, 3) float32 (PyTorch conv weight layout)
    bias       : (C_out,) float32
    scale      : (C_out,) float32 (the (1, C_out, 1, 1) parameter, squeezed)
    returns    : (N, C_out, H, W) float32
    """
    N, C_in, H, W = x_nchw.shape
    C_out = weight_oihw.shape[0]
    HW = H * W
    Nb = batch_block
    assert N % Nb == 0, "batch_block must divide N"

    # Free (metadata-only) reshape -- no pad / transpose of the activation in HBM.
    x_flat = x_nchw.reshape(N, C_in, HW)

    # Tiny parameter prep (O(9*C_in*C_out) elements).
    w_mat = jnp.transpose(weight_oihw, (0, 2, 3, 1)).reshape(C_out, 9 * C_in)
    m = jnp.exp(scale.reshape(C_out, 1) * 3.0)
    bm = bias.reshape(C_out, 1) * m
    keep = jnp.asarray(_border_keep_masks(H, W))

    kernel = _make_kernel(H, W, C_in, C_out, Nb)

    out_flat = pl.pallas_call(
        kernel,
        out_shape=jax.ShapeDtypeStruct((N, C_out, HW), x_nchw.dtype),
        grid_spec=pltpu.PrefetchScalarGridSpec(
            num_scalar_prefetch=0,
            grid=(N // Nb,),
            in_specs=[
                pl.BlockSpec((Nb, C_in, HW), lambda n: (n, 0, 0)),
                pl.BlockSpec((C_out, 9 * C_in), lambda n: (0, 0)),
                pl.BlockSpec((C_out, 1), lambda n: (0, 0)),
                pl.BlockSpec((C_out, 1), lambda n: (0, 0)),
                pl.BlockSpec((9, 1, HW), lambda n: (0, 0, 0)),
            ],
            out_specs=pl.BlockSpec((Nb, C_out, HW), lambda n: (n, 0, 0)),
            scratch_shapes=[
                pltpu.VMEM((C_in, 2 * HW), jnp.float32),      # doubled image
                pltpu.VMEM((9 * C_in, HW), jnp.float32),      # im2col
            ],
        ),
        compiler_params=pltpu.CompilerParams(
            dimension_semantics=("parallel",)),
    )(x_flat, w_mat, m, bm, keep)

    # Free reshape back to NCHW.
    return out_flat.reshape(N, C_out, H, W)


def _reference(x_nchw, weight_oihw, bias, scale):
    """Plain-JAX reference: pad-with-1 + 3x3 valid conv + bias + exp(3*scale)."""
    xp = jnp.pad(x_nchw, ((0, 0), (0, 0), (1, 1), (1, 1)), constant_values=1.0)
    out = jax.lax.conv_general_dilated(
        xp, weight_oihw, window_strides=(1, 1), padding="VALID",
        dimension_numbers=("NCHW", "OIHW", "NCHW"))
    out = out + bias[None, :, None, None]
    return out * jnp.exp(scale * 3.0)[None, :, None, None]


if __name__ == "__main__":
    key = jax.random.PRNGKey(0)
    N, C_in, C_out, H, W = 2, 4, 4, 16, 16
    kx, kw, kb, ks = jax.random.split(key, 4)

    # Quantize x / weights to the bf16 grid (still stored as f32) so the test is
    # tight regardless of the MXU's internal precision mode.
    x = jax.random.normal(kx, (N, C_in, H, W), dtype=jnp.float32)
    x = x.astype(jnp.bfloat16).astype(jnp.float32)

    # ZeroConv2d initializes weight/bias/scale to zero (output is identically 0),
    # which would hide any tap/bias/scale bug -- validate with random params first.
    weight = 0.1 * jax.random.normal(kw, (C_out, C_in, 3, 3), dtype=jnp.float32)
    weight = weight.astype(jnp.bfloat16).astype(jnp.float32)
    bias = jax.random.normal(kb, (C_out,), dtype=jnp.float32)
    scale = 0.3 * jax.random.normal(ks, (C_out,), dtype=jnp.float32)

    out = jax.block_until_ready(zero_conv2d(x, weight, bias, scale))
    ref = _reference(x, weight, bias, scale)
    assert out.shape == (N, C_out, H, W)
    assert jnp.allclose(out, ref, atol=1e-4, rtol=1e-4), \
        float(jnp.max(jnp.abs(out - ref)))

    # Zero-init case (the actual ZeroConv2d initialization): output must be 0.
    zw = jnp.zeros((C_out, C_in, 3, 3), jnp.float32)
    zb = jnp.zeros((C_out,), jnp.float32)
    zs = jnp.zeros((C_out,), jnp.float32)
    out0 = jax.block_until_ready(zero_conv2d(x, zw, zb, zs))
    assert jnp.allclose(out0, 0.0)

    print("KERNEL_OK")
</pallas_src>

<mosaic_0001>
module attributes {stable_mosaic.version = 11 : i64} {
  func.func @kernel(%arg0: i32, %arg1: memref<1x4x256xf32, #tpu.memory_space<vmem>>, %arg2: memref<4x36xf32, #tpu.memory_space<vmem>>, %arg3: memref<4x1xf32, #tpu.memory_space<vmem>>, %arg4: memref<4x1xf32, #tpu.memory_space<vmem>>, %arg5: memref<9x1x256xf32, #tpu.memory_space<vmem>>, %arg6: memref<1x4x256xf32, #tpu.memory_space<vmem>>, %arg7: memref<4x512xf32, #tpu.memory_space<vmem>>, %arg8: memref<36x256xf32, #tpu.memory_space<vmem>>) attributes {dimension_semantics = [#tpu.dimension_semantics<parallel>], iteration_bounds = array<i64: 2>, scalar_prefetch = 0 : i64, scratch_operands = 2 : i64, tpu.core_type = #tpu.core_type<tc>, window_params = [{transform_indices = @transform_0, window_bounds = array<i64: 1, 4, 256>}, {pipeline_mode = #tpu.pipeline_mode<synchronous>, transform_indices = @transform_1, window_bounds = array<i64: 4, 36>}, {pipeline_mode = #tpu.pipeline_mode<synchronous>, transform_indices = @transform_2, window_bounds = array<i64: 4, 1>}, {pipeline_mode = #tpu.pipeline_mode<synchronous>, transform_indices = @transform_3, window_bounds = array<i64: 4, 1>}, {pipeline_mode = #tpu.pipeline_mode<synchronous>, transform_indices = @transform_4, window_bounds = array<i64: 9, 1, 256>}, {transform_indices = @transform_5, window_bounds = array<i64: 1, 4, 256>}]} {
    %c0 = arith.constant 0 : index
    %c0_0 = arith.constant 0 : index
    %0 = vector.load %arg2[%c0, %c0_0] : memref<4x36xf32, #tpu.memory_space<vmem>>, vector<4x36xf32>
    %c0_1 = arith.constant 0 : index
    %c0_2 = arith.constant 0 : index
    %1 = vector.load %arg3[%c0_1, %c0_2] : memref<4x1xf32, #tpu.memory_space<vmem>>, vector<4x1xf32>
    %c0_3 = arith.constant 0 : index
    %c0_4 = arith.constant 0 : index
    %2 = vector.load %arg4[%c0_3, %c0_4] : memref<4x1xf32, #tpu.memory_space<vmem>>, vector<4x1xf32>
    %c0_5 = arith.constant 0 : index
    %c0_6 = arith.constant 0 : index
    %c0_7 = arith.constant 0 : index
    %3 = vector.load %arg1[%c0_5, %c0_6, %c0_7] : memref<1x4x256xf32, #tpu.memory_space<vmem>>, vector<1x4x256xf32>
    %4 = vector.shape_cast %3 : vector<1x4x256xf32> to vector<4x256xf32>
    %c0_8 = arith.constant 0 : index
    %c0_9 = arith.constant 0 : index
    %5 = vector.load %arg7[%c0_8, %c0_9] : memref<4x512xf32, #tpu.memory_space<vmem>>, vector<4x256xf32>
    tpu.vector_store %arg7[%c0_8, %c0_9], %4 {strides = array<i32>} : memref<4x512xf32, #tpu.memory_space<vmem>>, vector<4x256xf32>,
    %c0_10 = arith.constant 0 : index
    %c256 = arith.constant 256 : index
    %6 = vector.load %arg7[%c0_10, %c256] : memref<4x512xf32, #tpu.memory_space<vmem>>, vector<4x256xf32>
    tpu.vector_store %arg7[%c0_10, %c256], %4 {strides = array<i32>} : memref<4x512xf32, #tpu.memory_space<vmem>>, vector<4x256xf32>,
    %c0_11 = arith.constant 0 : index
    %c239 = arith.constant 239 : index
    %7 = vector.load %arg7[%c0_11, %c239] : memref<4x512xf32, #tpu.memory_space<vmem>>, vector<4x256xf32>
    %c0_12 = arith.constant 0 : index
    %c0_13 = arith.constant 0 : index
    %c0_14 = arith.constant 0 : index
    %8 = vector.load %arg5[%c0_12, %c0_13, %c0_14] : memref<9x1x256xf32, #tpu.memory_space<vmem>>, vector<1x1x256xf32>
    %9 = vector.shape_cast %8 : vector<1x1x256xf32> to vector<1x256xf32>
    %10 = vector.broadcast %9 : vector<1x256xf32> to vector<4x256xf32>
    %11 = arith.mulf %7, %10 : vector<4x256xf32>
    %cst = arith.constant 1.000000e+00 : f32
    %12 = vector.broadcast %cst : f32 to vector<1x256xf32>
    %13 = arith.subf %12, %9 : vector<1x256xf32>
    %14 = vector.broadcast %13 : vector<1x256xf32> to vector<4x256xf32>
    %15 = arith.addf %11, %14 : vector<4x256xf32>
    %c0_15 = arith.constant 0 : index
    %c0_16 = arith.constant 0 : index
    %16 = vector.load %arg8[%c0_15, %c0_16] : memref<36x256xf32, #tpu.memory_space<vmem>>, vector<4x256xf32>
    tpu.vector_store %arg8[%c0_15, %c0_16], %15 {strides = array<i32>} : memref<36x256xf32, #tpu.memory_space<vmem>>, vector<4x256xf32>,
    %c0_17 = arith.constant 0 : index
    %c240 = arith.constant 240 : index
    %17 = vector.load %arg7[%c0_17, %c240] : memref<4x512xf32, #tpu.memory_space<vmem>>, vector<4x256xf32>
    %c1 = arith.constant 1 : index
    %c0_18 = arith.constant 0 : index
    %c0_19 = arith.constant 0 : index
    %18 = vector.load %arg5[%c1, %c0_18, %c0_19] : memref<9x1x256xf32, #tpu.memory_space<vmem>>, vector<1x1x256xf32>
    %19 = vector.shape_cast %18 : vector<1x1x256xf32> to vector<1x256xf32>
    %20 = vector.broadcast %19 : vector<1x256xf32> to vector<4x256xf32>
    %21 = arith.mulf %17, %20 : vector<4x256xf32>
    %cst_20 = arith.constant 1.000000e+00 : f32
    %22 = vector.broadcast %cst_20 : f32 to vector<1x256xf32>
    %23 = arith.subf %22, %19 : vector<1x256xf32>
    %24 = vector.broadcast %23 : vector<1x256xf32> to vector<4x256xf32>
    %25 = arith.addf %21, %24 : vector<4x256xf32>
    %c4 = arith.constant 4 : index
    %c0_21 = arith.constant 0 : index
    %26 = vector.load %arg8[%c4, %c0_21] : memref<36x256xf32, #tpu.memory_space<vmem>>, vector<4x256xf32>
    tpu.vector_store %arg8[%c4, %c0_21], %25 {strides = array<i32>} : memref<36x256xf32, #tpu.memory_space<vmem>>, vector<4x256xf32>,
    %c0_22 = arith.constant 0 : index
    %c241 = arith.constant 241 : index
    %27 = vector.load %arg7[%c0_22, %c241] : memref<4x512xf32, #tpu.memory_space<vmem>>, vector<4x256xf32>
    %c2 = arith.constant 2 : index
    %c0_23 = arith.constant 0 : index
    %c0_24 = arith.constant 0 : index
    %28 = vector.load %arg5[%c2, %c0_23, %c0_24] : memref<9x1x256xf32, #tpu.memory_space<vmem>>, vector<1x1x256xf32>
    %29 = vector.shape_cast %28 : vector<1x1x256xf32> to vector<1x256xf32>
    %30 = vector.broadcast %29 : vector<1x256xf32> to vector<4x256xf32>
    %31 = arith.mulf %27, %30 : vector<4x256xf32>
    %cst_25 = arith.constant 1.000000e+00 : f32
    %32 = vector.broadcast %cst_25 : f32 to vector<1x256xf32>
    %33 = arith.subf %32, %29 : vector<1x256xf32>
    %34 = vector.broadcast %33 : vector<1x256xf32> to vector<4x256xf32>
    %35 = arith.addf %31, %34 : vector<4x256xf32>
    %c8 = arith.constant 8 : index
    %c0_26 = arith.constant 0 : index
    %36 = vector.load %arg8[%c8, %c0_26] : memref<36x256xf32, #tpu.memory_space<vmem>>, vector<4x256xf32>
    tpu.vector_store %arg8[%c8, %c0_26], %35 {strides = array<i32>} : memref<36x256xf32, #tpu.memory_space<vmem>>, vector<4x256xf32>,
    %c0_27 = arith.constant 0 : index
    %c255 = arith.constant 255 : index
    %37 = vector.load %arg7[%c0_27, %c255] : memref<4x512xf32, #tpu.memory_space<vmem>>, vector<4x256xf32>
    %c3 = arith.constant 3 : index
    %c0_28 = arith.constant 0 : index
    %c0_29 = arith.constant 0 : index
    %38 = vector.load %arg5[%c3, %c0_28, %c0_29] : memref<9x1x256xf32, #tpu.memory_space<vmem>>, vector<1x1x256xf32>
    %39 = vector.shape_cast %38 : vector<1x1x256xf32> to vector<1x256xf32>
    %40 = vector.broadcast %39 : vector<1x256xf32> to vector<4x256xf32>
    %41 = arith.mulf %37, %40 : vector<4x256xf32>
    %cst_30 = arith.constant 1.000000e+00 : f32
    %42 = vector.broadcast %cst_30 : f32 to vector<1x256xf32>
    %43 = arith.subf %42, %39 : vector<1x256xf32>
    %44 = vector.broadcast %43 : vector<1x256xf32> to vector<4x256xf32>
    %45 = arith.addf %41, %44 : vector<4x256xf32>
    %c12 = arith.constant 12 : index
    %c0_31 = arith.constant 0 : index
    %46 = vector.load %arg8[%c12, %c0_31] : memref<36x256xf32, #tpu.memory_space<vmem>>, vector<4x256xf32>
    tpu.vector_store %arg8[%c12, %c0_31], %45 {strides = array<i32>} : memref<36x256xf32, #tpu.memory_space<vmem>>, vector<4x256xf32>,
    %c0_32 = arith.constant 0 : index
    %c0_33 = arith.constant 0 : index
    %47 = vector.load %arg7[%c0_32, %c0_33] : memref<4x512xf32, #tpu.memory_space<vmem>>, vector<4x256xf32>
    %c4_34 = arith.constant 4 : index
    %c0_35 = arith.constant 0 : index
    %c0_36 = arith.constant 0 : index
    %48 = vector.load %arg5[%c4_34, %c0_35, %c0_36] : memref<9x1x256xf32, #tpu.memory_space<vmem>>, vector<1x1x256xf32>
    %49 = vector.shape_cast %48 : vector<1x1x256xf32> to vector<1x256xf32>
    %50 = vector.broadcast %49 : vector<1x256xf32> to vector<4x256xf32>
    %51 = arith.mulf %47, %50 : vector<4x256xf32>
    %cst_37 = arith.constant 1.000000e+00 : f32
    %52 = vector.broadcast %cst_37 : f32 to vector<1x256xf32>
    %53 = arith.subf %52, %49 : vector<1x256xf32>
    %54 = vector.broadcast %53 : vector<1x256xf32> to vector<4x256xf32>
    %55 = arith.addf %51, %54 : vector<4x256xf32>
    %c16 = arith.constant 16 : index
    %c0_38 = arith.constant 0 : index
    %56 = vector.load %arg8[%c16, %c0_38] : memref<36x256xf32, #tpu.memory_space<vmem>>, vector<4x256xf32>
    tpu.vector_store %arg8[%c16, %c0_38], %55 {strides = array<i32>} : memref<36x256xf32, #tpu.memory_space<vmem>>, vector<4x256xf32>,
    %c0_39 = arith.constant 0 : index
    %c1_40 = arith.constant 1 : index
    %57 = vector.load %arg7[%c0_39, %c1_40] : memref<4x512xf32, #tpu.memory_space<vmem>>, vector<4x256xf32>
    %c5 = arith.constant 5 : index
    %c0_41 = arith.constant 0 : index
    %c0_42 = arith.constant 0 : index
    %58 = vector.load %arg5[%c5, %c0_41, %c0_42] : memref<9x1x256xf32, #tpu.memory_space<vmem>>, vector<1x1x256xf32>
    %59 = vector.shape_cast %58 : vector<1x1x256xf32> to vector<1x256xf32>
    %60 = vector.broadcast %59 : vector<1x256xf32> to vector<4x256xf32>
    %61 = arith.mulf %57, %60 : vector<4x256xf32>
    %cst_43 = arith.constant 1.000000e+00 : f32
    %62 = vector.broadcast %cst_43 : f32 to vector<1x256xf32>
    %63 = arith.subf %62, %59 : vector<1x256xf32>
    %64 = vector.broadcast %63 : vector<1x256xf32> to vector<4x256xf32>
    %65 = arith.addf %61, %64 : vector<4x256xf32>
    %c20 = arith.constant 20 : index
    %c0_44 = arith.constant 0 : index
    %66 = vector.load %arg8[%c20, %c0_44] : memref<36x256xf32, #tpu.memory_space<vmem>>, vector<4x256xf32>
    tpu.vector_store %arg8[%c20, %c0_44], %65 {strides = array<i32>} : memref<36x256xf32, #tpu.memory_space<vmem>>, vector<4x256xf32>,
    %c0_45 = arith.constant 0 : index
    %c15 = arith.constant 15 : index
    %67 = vector.load %arg7[%c0_45, %c15] : memref<4x512xf32, #tpu.memory_space<vmem>>, vector<4x256xf32>
    %c6 = arith.constant 6 : index
    %c0_46 = arith.constant 0 : index
    %c0_47 = arith.constant 0 : index
    %68 = vector.load %arg5[%c6, %c0_46, %c0_47] : memref<9x1x256xf32, #tpu.memory_space<vmem>>, vector<1x1x256xf32>
    %69 = vector.shape_cast %68 : vector<1x1x256xf32> to vector<1x256xf32>
    %70 = vector.broadcast %69 : vector<1x256xf32> to vector<4x256xf32>
    %71 = arith.mulf %67, %70 : vector<4x256xf32>
    %cst_48 = arith.constant 1.000000e+00 : f32
    %72 = vector.broadcast %cst_48 : f32 to vector<1x256xf32>
    %73 = arith.subf %72, %69 : vector<1x256xf32>
    %74 = vector.broadcast %73 : vector<1x256xf32> to vector<4x256xf32>
    %75 = arith.addf %71, %74 : vector<4x256xf32>
    %c24 = arith.constant 24 : index
    %c0_49 = arith.constant 0 : index
    %76 = vector.load %arg8[%c24, %c0_49] : memref<36x256xf32, #tpu.memory_space<vmem>>, vector<4x256xf32>
    tpu.vector_store %arg8[%c24, %c0_49], %75 {strides = array<i32>} : memref<36x256xf32, #tpu.memory_space<vmem>>, vector<4x256xf32>,
    %c0_50 = arith.constant 0 : index
    %c16_51 = arith.constant 16 : index
    %77 = vector.load %arg7[%c0_50, %c16_51] : memref<4x512xf32, #tpu.memory_space<vmem>>, vector<4x256xf32>
    %c7 = arith.constant 7 : index
    %c0_52 = arith.constant 0 : index
    %c0_53 = arith.constant 0 : index
    %78 = vector.load %arg5[%c7, %c0_52, %c0_53] : memref<9x1x256xf32, #tpu.memory_space<vmem>>, vector<1x1x256xf32>
    %79 = vector.shape_cast %78 : vector<1x1x256xf32> to vector<1x256xf32>
    %80 = vector.broadcast %79 : vector<1x256xf32> to vector<4x256xf32>
    %81 = arith.mulf %77, %80 : vector<4x256xf32>
    %cst_54 = arith.constant 1.000000e+00 : f32
    %82 = vector.broadcast %cst_54 : f32 to vector<1x256xf32>
    %83 = arith.subf %82, %79 : vector<1x256xf32>
    %84 = vector.broadcast %83 : vector<1x256xf32> to vector<4x256xf32>
    %85 = arith.addf %81, %84 : vector<4x256xf32>
    %c28 = arith.constant 28 : index
    %c0_55 = arith.constant 0 : index
    %86 = vector.load %arg8[%c28, %c0_55] : memref<36x256xf32, #tpu.memory_space<vmem>>, vector<4x256xf32>
    tpu.vector_store %arg8[%c28, %c0_55], %85 {strides = array<i32>} : memref<36x256xf32, #tpu.memory_space<vmem>>, vector<4x256xf32>,
    %c0_56 = arith.constant 0 : index
    %c17 = arith.constant 17 : index
    %87 = vector.load %arg7[%c0_56, %c17] : memref<4x512xf32, #tpu.memory_space<vmem>>, vector<4x256xf32>
    %c8_57 = arith.constant 8 : index
    %c0_58 = arith.constant 0 : index
    %c0_59 = arith.constant 0 : index
    %88 = vector.load %arg5[%c8_57, %c0_58, %c0_59] : memref<9x1x256xf32, #tpu.memory_space<vmem>>, vector<1x1x256xf32>
    %89 = vector.shape_cast %88 : vector<1x1x256xf32> to vector<1x256xf32>
    %90 = vector.broadcast %89 : vector<1x256xf32> to vector<4x256xf32>
    %91 = arith.mulf %87, %90 : vector<4x256xf32>
    %cst_60 = arith.constant 1.000000e+00 : f32
    %92 = vector.broadcast %cst_60 : f32 to vector<1x256xf32>
    %93 = arith.subf %92, %89 : vector<1x256xf32>
    %94 = vector.broadcast %93 : vector<1x256xf32> to vector<4x256xf32>
    %95 = arith.addf %91, %94 : vector<4x256xf32>
    %c32 = arith.constant 32 : index
    %c0_61 = arith.constant 0 : index
    %96 = vector.load %arg8[%c32, %c0_61] : memref<36x256xf32, #tpu.memory_space<vmem>>, vector<4x256xf32>
    tpu.vector_store %arg8[%c32, %c0_61], %95 {strides = array<i32>} : memref<36x256xf32, #tpu.memory_space<vmem>>, vector<4x256xf32>,
    %c0_62 = arith.constant 0 : index
    %c0_63 = arith.constant 0 : index
    %97 = vector.load %arg8[%c0_62, %c0_63] : memref<36x256xf32, #tpu.memory_space<vmem>>, vector<36x256xf32>
    %cst_64 = arith.constant dense<0.000000e+00> : vector<4x256xf32>
    %98 = tpu.matmul %0, %97, %cst_64 {dimension_numbers = #tpu.dot_dimension_numbers<[1], [0], [0], [1], [0, 0, 1, 1], [], []>} : vector<4x36xf32>, vector<36x256xf32>, vector<4x256xf32> -> vector<4x256xf32>
    %99 = vector.broadcast %1 : vector<4x1xf32> to vector<4x256xf32>
    %100 = arith.mulf %98, %99 : vector<4x256xf32>
    %101 = vector.broadcast %2 : vector<4x1xf32> to vector<4x256xf32>
    %102 = arith.addf %100, %101 : vector<4x256xf32>
    %c0_65 = arith.constant 0 : index
    %c0_66 = arith.constant 0 : index
    %c0_67 = arith.constant 0 : index
    %103 = vector.load %arg6[%c0_65, %c0_66, %c0_67] : memref<1x4x256xf32, #tpu.memory_space<vmem>>, vector<1x4x256xf32>
    %104 = vector.shape_cast %103 : vector<1x4x256xf32> to vector<4x256xf32>
    %105 = vector.shape_cast %102 : vector<4x256xf32> to vector<1x4x256xf32>
    tpu.vector_store %arg6[%c0_65, %c0_66, %c0_67], %105 {strides = array<i32>} : memref<1x4x256xf32, #tpu.memory_space<vmem>>, vector<1x4x256xf32>,
    return
  }
  func.func @transform_0(%arg0: i32) -> (i32, i32, i32) {
    %c0_i32 = arith.constant 0 : i32
    %c0_i32_0 = arith.constant 0 : i32
    %c0_i32_1 = arith.constant 0 : i32
    return %arg0, %c0_i32, %c0_i32_0 : i32, i32, i32
  }
  func.func @transform_1(%arg0: i32) -> (i32, i32) {
    %c0_i32 = arith.constant 0 : i32
    %c0_i32_0 = arith.constant 0 : i32
    %c0_i32_1 = arith.constant 0 : i32
    return %c0_i32, %c0_i32_0 : i32, i32
  }
  func.func @transform_2(%arg0: i32) -> (i32, i32) {
    %c0_i32 = arith.constant 0 : i32
    %c0_i32_0 = arith.constant 0 : i32
    %c0_i32_1 = arith.constant 0 : i32
    return %c0_i32, %c0_i32_0 : i32, i32
  }
  func.func @transform_3(%arg0: i32) -> (i32, i32) {
    %c0_i32 = arith.constant 0 : i32
    %c0_i32_0 = arith.constant 0 : i32
    %c0_i32_1 = arith.constant 0 : i32
    return %c0_i32, %c0_i32_0 : i32, i32
  }
  func.func @transform_4(%arg0: i32) -> (i32, i32, i32) {
    %c0_i32 = arith.constant 0 : i32
    %c0_i32_0 = arith.constant 0 : i32
    %c0_i32_1 = arith.constant 0 : i32
    %c0_i32_2 = arith.constant 0 : i32
    return %c0_i32, %c0_i32_0, %c0_i32_1 : i32, i32, i32
  }
  func.func @transform_5(%arg0: i32) -> (i32, i32, i32) {
    %c0_i32 = arith.constant 0 : i32
    %c0_i32_0 = arith.constant 0 : i32
    %c0_i32_1 = arith.constant 0 : i32
    return %arg0, %c0_i32, %c0_i32_0 : i32, i32, i32
  }
}

</mosaic_0001>

<bundles_post_ra>
// kernel: zero_conv2d.1
= control target key start
LH: loop header
LB: loop body
LE: loop exit
PB: predicated region body
PF: predicated region fallthrough
CT: control target
= control target key end

     0   :  { %s989_s18 = smov 0   ;;  %s1204_s0 = inlined_call_operand.vmem [shape: f32[2,4,256], index: 0, kind: input, shape index: {}]   ;;  %s1205_s1 = inlined_call_operand.vmem [shape: f32[4,36], index: 1, kind: input, shape index: {}]   ;;  %s1206_s2 = inlined_call_operand.vmem [shape: f32[4,1], index: 2, kind: input, shape index: {}]   ;;  %s1207_s3 = inlined_call_operand.vmem [shape: f32[4,1], index: 3, kind: input, shape index: {}]   ;;  %s1208_s4 = inlined_call_operand.vmem [shape: f32[9,1,256], index: 4, kind: input, shape index: {}]   ;;  %s1209_s5 = inlined_call_operand.vmem [shape: f32[2,4,256], index: 5, kind: output, shape index: {}]  }
   0x1 LB: > { %s889_s19 = sadd.s32 4294967295, %s947_s18   ;;  %p893_p0 = scmp.ge.s32.totalorder %s947_s18, 1  ;;  %s947_s18 = sphi %s989_s18, %s15_s18  }
   0x2   : > { %p187_p1 = scmp.lt.s32.totalorder %s947_s18, 3 }
   0x4   : > { %p188_p2 = pnand %p893_p0, %p187_p1 }
   0x5   : > { %v235_v0 = vlaneseq (!%p188_p2)  ;;  %v898_v2 = vld [vmem:[%s1208_s4 + $0x2] sm:$0x3] (!%p188_p2)  ;;  %v233_v3 = vld [vmem:[%s1208_s4] sm:$0x3] (!%p188_p2)  ;;  %v900_v6 = vld [vmem:[%s1208_s4 + $0x6] sm:$0x3] (!%p188_p2) }
   0x6   : > { %191 = sbr.rel (%p188_p2) target bundleno = 538 (0x21a), region = 40  ;;  %v899_v7 = vld [vmem:[%s1208_s4 + $0x4] sm:$0x3] (!%p188_p2)  ;;  %v253_v9 = vsub.f32 (!%p188_p2), 1.0, %v233_v3  ;;  %p215_p3 = scmp.lt.s32.totalorder (!%p188_p2), %s889_s19, 1  ;;  %v428_v23 = vsub.f32 (!%p188_p2), 1.0, %v900_v6 }
   0x7   : > { %v236_v1 = vshrl.u32 (!%p188_p2), %v235_v0, 7  ;;  %v370_v8 = vsub.f32 (!%p188_p2), 1.0, %v899_v7  ;;  %s949_s29 = smov (!%p188_p2), 112   ;;  %s950_s30 = smov (!%p188_p2), 111   ;;  %v311_v27 = vsub.f32 (!%p188_p2), 1.0, %v898_v2  ;;  %vm305_vm0 = vcmask (!%p188_p2), 916480  }
   0x8   : > { %s951_s9 = smov (!%p188_p2), 127   ;;  %s952_s10 = smov (!%p188_p2), 113   ;;  %v902_v35 = vld [vmem:[%s1208_s4 + $0xa] sm:$0x3] (!%p188_p2)  ;;  %v903_v36 = vld [vmem:[%s1208_s4 + $0xc] sm:$0x3] (!%p188_p2) }
   0x9   : > { %v1003_v4 = vsub.s32 (!%p188_p2), 0, %v236_v1  ;;  %v1005_v5 = vsub.s32 (!%p188_p2), 1, %v236_v1  ;;  %v576_v40 = vsub.f32 (!%p188_p2), 1.0, %v903_v36  ;;  %v904_v44 = vld [vmem:[%s1208_s4 + $0xe] sm:$0x3] (!%p188_p2)  ;;  %v519_v52 = vsub.f32 (!%p188_p2), 1.0, %v902_v35 }
   0xa   : > { %v632_v48 = vsub.f32 (!%p188_p2), 1.0, %v904_v44  ;;  %v905_v53 = vld [vmem:[%s1208_s4 + $0x10] sm:$0x3] (!%p188_p2)  ;;  %s953_s21 = smov (!%p188_p2), 1   ;;  %s954_s22 = smov (!%p188_p2), 15   ;;  %vm422_vm1 = vcmask (!%p188_p2), 1039360  }
   0xb   : > { %v296_v10 = vrot.slane (!%p188_p2), %v898_v2, %v1003_v4  ;;  %v300_v11 = vrot.slane (!%p188_p2), %v898_v2, %v1005_v5  ;;  %v238_v12 = vrot.slane (!%p188_p2), %v233_v3, %v1003_v4  ;;  %v242_v13 = vrot.slane (!%p188_p2), %v233_v3, %v1005_v5  ;;  %s955_s23 = smov (!%p188_p2), 16   ;;  %s956_s24 = smov (!%p188_p2), 17  }
   0xc   : > { %v413_v14 = vrot.slane (!%p188_p2), %v900_v6, %v1003_v4  ;;  %v417_v15 = vrot.slane (!%p188_p2), %v900_v6, %v1005_v5  ;;  %v355_v16 = vrot.slane (!%p188_p2), %v899_v7, %v1003_v4  ;;  %v359_v17 = vrot.slane (!%p188_p2), %v899_v7, %v1005_v5 }
   0xd   : > { %s1211_s19 = smov (!%p215_p3, %s889_s19), 1  ;;  %v301_v18 = vcombine.low %v296_v10, %v300_v11  ;;  %v243_v19 = vcombine.low %v238_v12, %v242_v13  ;;  %v375_v21 = vrot.slane %v370_v8, %v1003_v4  ;;  %v379_v22 = vrot.slane %v370_v8, %v1005_v5 }
   0xe   : > { %v418_v20 = vcombine.low %v413_v14, %v417_v15  ;;  %s911_s28 = sshll.u32 %s1211_s19, 3  ;;  %v360_v24 = vcombine.low %v355_v16, %v359_v17  ;;  %v258_v25 = vrot.slane %v253_v9, %v1003_v4  ;;  %v262_v26 = vrot.slane %v253_v9, %v1005_v5 }
   0xf   : > { %302 = vrot.lane.b32.xlu1 %v301_v18, %s949_s29  ;;  %244 = vrot.lane.b32.xlu0 %v243_v19, %s950_s30  ;;  %s219_s8 = scalar_lea.vmem %s1204_s0, %s911_s28  ;;  %v380_v29 = vcombine.low %v375_v21, %v379_v22  ;;  %v433_v30 = vrot.slane %v428_v23, %v1003_v4  ;;  %v437_v31 = vrot.slane %v428_v23, %v1005_v5  ;;  %v689_v60 = vsub.f32 1.0, %v905_v53  ;;  %s224_s11 = scalar_lea.vmem %s1209_s5, %s911_s28 }
  0x10   : > { %v1035_v28 = vld [vmem:[%s219_s8] sm:$0xff]  ;;  %v263_v32 = vcombine.low %v258_v25, %v262_v26  ;;  %v316_v33 = vrot.slane %v311_v27, %v1003_v4  ;;  %v320_v34 = vrot.slane %v311_v27, %v1005_v5  ;;  %v505_v38 = vrot.slane %v902_v35, %v1003_v4 }
  0x11   : > { %229 = vst [vmem:[#allocation2] sm:$0xff] %v1035_v28  ;;  %230 = vst [vmem:[#allocation2 + $0x8] sm:$0xff] %v1035_v28  ;;  %v438_v37 = vcombine.low %v433_v30, %v437_v31  ;;  %v509_v39 = vrot.slane %v902_v35, %v1005_v5  ;;  %v562_v42 = vrot.slane %v903_v36, %v1003_v4  ;;  %vm247_vm2 = vcmask 908288  }
  0x12   : > { %v321_v41 = vcombine.low %v316_v33, %v320_v34  ;;  %v566_v43 = vrot.slane %v903_v36, %v1005_v5  ;;  %v581_v45 = vrot.slane %v576_v40, %v1003_v4  ;;  %v585_v46 = vrot.slane %v576_v40, %v1005_v5 }
  0x13   : > { %419 = vrot.lane.b32.xlu1 %v418_v20, %s951_s9  ;;  %361 = vrot.lane.b32.xlu0 %v360_v24, %s952_s10  ;;  %v618_v47 = vrot.slane %v904_v44, %v1003_v4  ;;  %v510_v49 = vcombine.low %v505_v38, %v509_v39  ;;  %v622_v51 = vrot.slane %v904_v44, %v1005_v5  ;;  %vm364_vm3 = vcmask 924672  }
  0x14   : > { %v567_v50 = vcombine.low %v562_v42, %v566_v43  ;;  %v586_v54 = vcombine.low %v581_v45, %v585_v46  ;;  %v637_v55 = vrot.slane %v632_v48, %v1003_v4  ;;  %v641_v56 = vrot.slane %v632_v48, %v1005_v5 }
  0x15   : > { %v623_v57 = vcombine.low %v618_v47, %v622_v51  ;;  %v524_v58 = vrot.slane %v519_v52, %v1003_v4  ;;  %v528_v59 = vrot.slane %v519_v52, %v1005_v5  ;;  %v675_v62 = vrot.slane %v905_v53, %v1003_v4 }
  0x16   : > { %v642_v61 = vcombine.low %v637_v55, %v641_v56  ;;  %v679_v63 = vrot.slane %v905_v53, %v1005_v5  ;;  %v694_v1 = vrot.slane %v689_v60, %v1003_v4  ;;  %v698_v2 = vrot.slane %v689_v60, %v1005_v5 }
  0x17   : > { %381 = vrot.lane.b32.xlu1 %v380_v29, %s952_s10  ;;  %264 = vrot.lane.b32.xlu0 %v263_v32, %s950_s30  ;;  %v529_v0 = vcombine.low %v524_v58, %v528_v59  ;;  %v901_v32 = vld [vmem:[%s1208_s4 + $0x8] sm:$0x3]  ;;  %vm457_vm4 = vcmask 7168   ;;  %vm340_vm5 = vcmask 130048   ;;  %vm398_vm6 = vcmask 121856  }
  0x18   : > { %v680_v3 = vcombine.low %v675_v62, %v679_v63  ;;  %v699_v6 = vcombine.low %v694_v1, %v698_v2  ;;  %v232_v12 = vld [vmem:[#allocation2 + $0xc] sm:$0xf]  ;;  %v288_v20 = vld [vmem:[#allocation2 + $0x4] sm:$0xff]  ;;  %v471_v40 = vrot.slane %v901_v32, %v1003_v4  ;;  %v479_v47 = vsub.f32 1.0, %v901_v32 }
  0x19   : > { %v348_v19 = vld [vmem:[#allocation2 + $0xc] sm:$0xf]  ;;  %v555_v39 = vld [vmem:[#allocation2 + $0x8] sm:$0xf]  ;;  %vm281_vm7 = vcmask 138240   ;;  %vm737_vm8 = vcmask 1043456  }
  0x1a   : > { %v289_v44 = vld [vmem:[#allocation2 + $0xc] sm:$0xf]  ;;  %v484_v53 = vrot.slane %v479_v47, %v1003_v4  ;;  %vm733_vm9 = vcmask 293888  }
  0x1b   : > { %439 = vrot.lane.b32.xlu1 %v438_v37, %s951_s9  ;;  %322 = vrot.lane.b32.xlu0 %v321_v41, %s949_s29  ;;  %v475_v41 = vrot.slane %v901_v32, %v1005_v5  ;;  %v406_v59 = vld [vmem:[#allocation2 + $0xc] sm:$0xf] }
  0x1d   : > { %v476_v46 = vcombine.low %v471_v40, %v475_v41 }
  0x1f   : > { %511 = vrot.lane.b32.xlu1 %v510_v49, %s953_s21  ;;  %568 = vrot.lane.b32.xlu0 %v567_v50, %s954_s22  ;;  %v478_v60 = vmul.f32 %v476_v46, %v1035_v28 }
  0x23   : > { %587 = vrot.lane.b32.xlu1 %v586_v54, %s954_s22  ;;  %624 = vrot.lane.b32.xlu0 %v623_v57, %s955_s23  ;;  %v488_v57 = vrot.slane %v479_v47, %v1005_v5 }
  0x25   : > { %v489_v2 = vcombine.low %v484_v53, %v488_v57  ;;  %v668_v53 = vld [vmem:[#allocation2 + $0x8] sm:$0xf]  ;;  %v958_v57 = vmov 0  }
  0x26   : > { %940 = vset.pattern.permute.xlu1 %v958_v57  ;;  %939 = vset.pattern.permute.xlu0 %v958_v57 }
  0x27   : > { %643 = vrot.lane.b32.xlu1 %v642_v61, %s955_s23  ;;  %530 = vrot.lane.b32.xlu0 %v529_v0, %s953_s21 }
  0x2b   : > { %681 = vrot.lane.b32.xlu0 %v680_v3, %s956_s24  ;;  %700 = vrot.lane.b32.xlu1 %v699_v6, %s956_s24 }
  0x81   : > { %v303_v7 = vpop.permute.xlu1 %302  ;;  %v245_v8 = vpop.permute.xlu0 %244 }
  0x82   : > { %v246_v11 = vrot.slane %v245_v8, 4  ;;  %v304_v13 = vrot.slane %v303_v7, 4 }
  0x84   : > { %v252_v16 = vmul.f32 %v246_v11, %v232_v12  ;;  %v306_v21 = vsel %vm305_vm0, %v304_v13, %v303_v7  ;;  %v248_v48 = vsel %vm247_vm2, %v246_v11, %v245_v8  ;;  %v310_v54 = vmul.f32 %v304_v13, %v289_v44 }
  0x85   : > { %v1085_v9 = vpop.permute.xlu1 %419  ;;  %v362_v10 = vpop.permute.xlu0 %361  ;;  %v309_v31 = vmul.f32 %v306_v21, %v288_v20  ;;  %v251_v58 = vmul.f32 %v288_v20, %v248_v48  ;;  %v491_v11 = vadd.f32 %v489_v2, %v478_v60 }
  0x86   : > { %v363_v17 = vrot.slane %v362_v10, 4  ;;  %v421_v22 = vrot.slane %v1085_v9, 4 }
  0x87   : > { %495 = vst [vmem:[#allocation3 + $0x20] sm:$0xf] %v491_v11 }
  0x88   : > { %v369_v27 = vmul.f32 %v363_v17, %v348_v19  ;;  %v423_v33 = vsel %vm422_vm1, %v421_v22, %v1085_v9  ;;  %v365_v61 = vsel %vm364_vm3, %v363_v17, %v362_v10  ;;  %v427_v3 = vmul.f32 %v421_v22, %v406_v59  ;;  %v498_v9 = vld [vmem:[#allocation2 + $0x8] sm:$0xf]  ;;  %v226_v59 = vld [vmem:[%s1206_s2] sm:$0xf] }
  0x89   : > { %v1087_v14 = vpop.permute.xlu1 %381  ;;  %v265_v15 = vpop.permute.xlu0 %264  ;;  %v426_v45 = vmul.f32 %v423_v33, %v288_v20  ;;  %v368_v8 = vmul.f32 %v365_v61, %v288_v20  ;;  %v611_v17 = vld [vmem:[#allocation2 + $0x8] sm:$0xf] }
  0x8a   : > { %v266_v18 = vrot.slane %v265_v15, 4  ;;  %v383_v23 = vrot.slane %v1087_v14, 4 }
  0x8c   : > { %v271_v24 = vadd.f32 %v266_v18, %v252_v16  ;;  %v388_v34 = vadd.f32 %v383_v23, %v369_v27  ;;  %v267_v55 = vsel %vm247_vm2, %v266_v18, %v265_v15  ;;  %v384_v5 = vsel %vm364_vm3, %v383_v23, %v1087_v14 }
  0x8d   : > { %v440_v25 = vpop.permute.xlu1 %439  ;;  %v323_v26 = vpop.permute.xlu0 %322  ;;  %v270_v0 = vadd.f32 %v267_v55, %v251_v58  ;;  %v387_v16 = vadd.f32 %v384_v5, %v368_v8  ;;  %v493_v18 = vcombine.high %v491_v11, %v491_v11  ;;  %v227_v58 = vld [vmem:[%s1207_s3] sm:$0xf] }
  0x8e   : > { %v441_v29 = vrot.slane %v440_v25, 4  ;;  %v324_v30 = vrot.slane %v323_v26, 4  ;;  %279 = vrot.lane.b32.xlu1 %v271_v24, %s956_s24 }
  0x8f   : > { %496 = vst [vmem:[#allocation3 + $0x28] sm:$0xf] %v493_v18  ;;  %v274_v41 = vcombine.high %v270_v0, %v270_v0  ;;  %v391_v46 = vcombine.high %v387_v16, %v387_v16 }
  0x90   : > { %v325_v35 = vsel %vm305_vm0, %v324_v30, %v323_v26  ;;  %v442_v42 = vsel %vm422_vm1, %v441_v29, %v440_v25  ;;  %v329_v62 = vadd.f32 %v324_v30, %v310_v54  ;;  %v446_v12 = vadd.f32 %v441_v29, %v427_v3 }
  0x91   : > { %v1099_v36 = vadd.f32 %v325_v35, %v309_v31  ;;  %v512_v37 = vpop.permute.xlu1 %511  ;;  %v1101_v38 = vpop.permute.xlu0 %568  ;;  %v1113_v50 = vadd.f32 %v442_v42, %v426_v45 }
  0x92   : > { %v570_v43 = vrot.slane %v1101_v38, 4  ;;  %396 = vrot.lane.b32.xlu1 %v388_v34, %s954_s22  ;;  %v513_v63 = vrot.slane %v512_v37, 4  ;;  %v333_v15 = vcombine.low %v329_v62, %v329_v62  ;;  %v450_v25 = vcombine.low %v446_v12, %v446_v12 }
  0x93   : > { %336 = vrot.lane.b32.xlu0 %v1099_v36, %s955_s23  ;;  %v332_v44 = vcombine.low %v1099_v36, %v1099_v36 }
  0x94   : > { %v575_v49 = vmul.f32 %v570_v43, %v555_v39  ;;  %v514_v13 = vsel %vm457_vm4, %v513_v63, %v512_v37  ;;  %v518_v14 = vmul.f32 %v513_v63, %v498_v9  ;;  %v571_v34 = vsel %vm398_vm6, %v570_v43, %v1101_v38 }
  0x95   : > { %v1115_v51 = vpop.permute.xlu1 %587  ;;  %v625_v52 = vpop.permute.xlu0 %624  ;;  %v517_v22 = vmul.f32 %v514_v13, %v1035_v28  ;;  %v574_v40 = vmul.f32 %v571_v34, %v1035_v28 }
  0x96   : > { %v589_v56 = vrot.slane %v1115_v51, 4  ;;  %v626_v6 = vrot.slane %v625_v52, 4 }
  0x97   : > { %453 = vrot.lane.b32.xlu0 %v1113_v50, %s953_s21 }
  0x98   : > { %v594_v4 = vadd.f32 %v589_v56, %v575_v49  ;;  %v627_v19 = vsel %vm340_vm5, %v626_v6, %v625_v52  ;;  %v631_v23 = vmul.f32 %v626_v6, %v611_v17  ;;  %v590_v42 = vsel %vm398_vm6, %v589_v56, %v1115_v51 }
  0x99   : > { %v531_v1 = vpop.permute.xlu0 %530  ;;  %v644_v10 = vpop.permute.xlu1 %643  ;;  %v630_v26 = vmul.f32 %v627_v19, %v1035_v28  ;;  %v593_v45 = vadd.f32 %v590_v42, %v574_v40  ;;  %v449_v49 = vcombine.low %v1113_v50, %v1113_v50  ;;  %v957_v56 = vmov 0.0  }
  0x9a   : > { %v532_v7 = vrot.slane %v531_v1, 4  ;;  %602 = vrot.lane.b32.xlu1 %v594_v4, %s952_s10  ;;  %v645_v21 = vrot.slane %v644_v10, 4  ;;  %808 = vmatprep.mubr.f32.mxu0 %v957_v56 }
  0x9b   : > { %275 = vrot.lane.b32.xlu0 %v270_v0, %s956_s24  ;;  %v597_v51 = vcombine.high %v593_v45, %v593_v45 }
  0x9c   : > { %v533_v20 = vsel %vm457_vm4, %v532_v7, %v531_v1  ;;  %v537_v24 = vadd.f32 %v532_v7, %v518_v14  ;;  %v646_v29 = vsel %vm340_vm5, %v645_v21, %v644_v10  ;;  %v650_v30 = vadd.f32 %v645_v21, %v631_v23 }
  0x9d   : > { %v536_v27 = vadd.f32 %v533_v20, %v517_v22  ;;  %v682_v32 = vpop.permute.xlu0 %681  ;;  %v649_v33 = vadd.f32 %v646_v29, %v630_v26  ;;  %v701_v39 = vpop.permute.xlu1 %700 }
  0x9e   : > { %338 = vrot.lane.b32.xlu1 %v333_v15, %s955_s23  ;;  %v541_v31 = vcombine.low %v537_v24, %v537_v24  ;;  %v683_v35 = vrot.slane %v682_v32, 4  ;;  %v654_v37 = vcombine.low %v650_v30, %v650_v30  ;;  %v702_v43 = vrot.slane %v701_v39, 4 }
  0x9f   : > { %392 = vrot.lane.b32.xlu0 %v387_v16, %s954_s22  ;;  %v540_v36 = vcombine.low %v536_v27, %v536_v27  ;;  %v653_v55 = vcombine.low %v649_v33, %v649_v33 }
  0xa0   : > { %v684_v38 = vsel %vm281_vm7, %v683_v35, %v682_v32  ;;  %v703_v48 = vsel %vm281_vm7, %v702_v43, %v701_v39 }
  0xa1   : > { %v687_v47 = vmul.f32 %v684_v38, %v1035_v28  ;;  %v688_v28 = vmul.f32 %v683_v35, %v668_v53 }
  0xa2   : > { %455 = vrot.lane.b32.xlu1 %v450_v25, %s953_s21 }
  0xa3   : > { %544 = vrot.lane.b32.xlu0 %v536_v27, %s951_s9  ;;  %v706_v52 = vadd.f32 %v703_v48, %v687_v47  ;;  %v707_v50 = vadd.f32 %v702_v43, %v688_v28 }
  0xa5   : > { %v710_v54 = vcombine.high %v706_v52, %v706_v52 }
  0xa6   : > { %546 = vrot.lane.b32.xlu1 %v541_v31, %s951_s9 }
  0xa7   : > { %657 = vrot.lane.b32.xlu0 %v649_v33, %s949_s29 }
  0xaa   : > { %659 = vrot.lane.b32.xlu1 %v654_v37, %s949_s29 }
  0xab   : > { %277 = vrot.lane.b32.xlu0 %v274_v41, %s956_s24 }
  0xae   : > { %334 = vrot.lane.b32.xlu1 %v332_v44, %s955_s23 }
  0xaf   : > { %394 = vrot.lane.b32.xlu0 %v391_v46, %s954_s22 }
  0xb2   : > { %451 = vrot.lane.b32.xlu1 %v449_v49, %s953_s21 }
  0xb3   : > { %600 = vrot.lane.b32.xlu0 %v597_v51, %s952_s10 }
  0xb6   : > { %598 = vrot.lane.b32.xlu1 %v593_v45, %s952_s10 }
  0xb7   : > { %542 = vrot.lane.b32.xlu0 %v540_v36, %s951_s9 }
  0xba   : > { %713 = vrot.lane.b32.xlu1 %v710_v54, %s950_s30 }
  0xbb   : > { %655 = vrot.lane.b32.xlu0 %v653_v55, %s949_s29 }
  0xbe   : > { %711 = vrot.lane.b32.xlu1 %v706_v52, %s950_s30  ;;  %v225_v52 = vld [vmem:[%s1205_s1] sm:$0xf] }
  0xbf   : > { %715 = vrot.lane.b32.xlu0 %v707_v50, %s950_s30 }
  0xc2   : > { %824 = vperm.xlu1 %940, %v227_v58  }
  0xc3   : > { %817 = vperm.xlu0 %939, %v226_v59  }
 0x100   : > { %v280_v60 = vpop.permute.xlu1 %279 }
 0x104   : > { %v397_v62 = vpop.permute.xlu1 %396 }
 0x105   : > { %v337_v61 = vpop.permute.xlu0 %336 }
 0x109   : > { %v454_v63 = vpop.permute.xlu0 %453 }
 0x10c   : > { %v603_v4 = vpop.permute.xlu1 %602 }
 0x10d   : > { %v276_v0 = vpop.permute.xlu0 %275 }
 0x110   : > { %v339_v1 = vpop.permute.xlu1 %338 }
 0x111   : > { %v342_v2 = vsel %vm340_vm5, %v337_v61, %v339_v1  ;;  %v393_v3 = vpop.permute.xlu0 %392 }
 0x112   : > { %346 = vst [vmem:[#allocation3 + $0x8] sm:$0xf0] %v342_v2 }
 0x114   : > { %v456_v5 = vpop.permute.xlu1 %455 }
 0x115   : > { %v459_v6 = vsel %vm457_vm4, %v454_v63, %v456_v5  ;;  %v545_v7 = vpop.permute.xlu0 %544 }
 0x116   : > { %463 = vst [vmem:[#allocation3 + $0x18] sm:$0xf0] %v459_v6 }
 0x118   : > { %v547_v8 = vpop.permute.xlu1 %546 }
 0x119   : > { %v549_v9 = vsel %vm422_vm1, %v545_v7, %v547_v8  ;;  %v658_v10 = vpop.permute.xlu0 %657 }
 0x11a   : > { %553 = vst [vmem:[#allocation3 + $0x28] sm:$0xf0] %v549_v9 }
 0x11c   : > { %v660_v11 = vpop.permute.xlu1 %659 }
 0x11d   : > { %v662_v12 = vsel %vm305_vm0, %v658_v10, %v660_v11  ;;  %v278_v13 = vpop.permute.xlu0 %277 }
 0x11e   : > { %666 = vst [vmem:[#allocation3 + $0x38] sm:$0xf0] %v662_v12  ;;  %v282_v15 = vsel %vm281_vm7, %v276_v0, %v278_v13  ;;  %v283_v16 = vsel %vm281_vm7, %v278_v13, %v280_v60 }
 0x11f   : > { %286 = vst [vmem:[#allocation3] sm:$0xf] %v282_v15  ;;  %287 = vst [vmem:[#allocation3 + $0x8] sm:$0xf] %v283_v16 }
 0x120   : > { %v335_v17 = vpop.permute.xlu1 %334 }
 0x121   : > { %v341_v18 = vsel %vm340_vm5, %v335_v17, %v337_v61  ;;  %v395_v14 = vpop.permute.xlu0 %394  ;;  %v728_v41 = vld [vmem:[#allocation3 + $0x28] sm:$0xff] }
 0x122   : > { %345 = vst [vmem:[#allocation3] sm:$0xf0] %v341_v18  ;;  %v399_v19 = vsel %vm398_vm6, %v393_v3, %v395_v14  ;;  %v400_v21 = vsel %vm398_vm6, %v395_v14, %v397_v62 }
 0x123   : > { %403 = vst [vmem:[#allocation3 + $0x10] sm:$0xf] %v399_v19  ;;  %404 = vst [vmem:[#allocation3 + $0x18] sm:$0xf] %v400_v21 }
 0x124   : > { %v452_v20 = vpop.permute.xlu1 %451 }
 0x125   : > { %v458_v22 = vsel %vm457_vm4, %v452_v20, %v454_v63  ;;  %v601_v23 = vpop.permute.xlu0 %600 }
 0x126   : > { %462 = vst [vmem:[#allocation3 + $0x10] sm:$0xf0] %v458_v22  ;;  %v605_v24 = vsel %vm364_vm3, %v601_v23, %v603_v4  ;;  %v724_v30 = vld [vmem:[#allocation3 + $0x8] sm:$0xff] }
 0x127   : > { %609 = vst [vmem:[#allocation3 + $0x38] sm:$0xf] %v605_v24 }
 0x128   : > { %v599_v25 = vpop.permute.xlu1 %598 }
 0x129   : > { %v604_v26 = vsel %vm364_vm3, %v599_v25, %v601_v23  ;;  %v543_v27 = vpop.permute.xlu0 %542  ;;  %v723_v35 = vld [vmem:[#allocation3] sm:$0xff] }
 0x12a   : > { %608 = vst [vmem:[#allocation3 + $0x30] sm:$0xf] %v604_v26  ;;  %v548_v29 = vsel %vm422_vm1, %v543_v27, %v545_v7  ;;  %v726_v31 = vld [vmem:[#allocation3 + $0x18] sm:$0xff] }
 0x12b   : > { %552 = vst [vmem:[#allocation3 + $0x20] sm:$0xf0] %v548_v29  ;;  %v913_v32 = vpack.c.bf16 %v726_v31, %v724_v30 }
 0x12c   : > { %v714_v33 = vpop.permute.xlu1 %713 }
 0x12d   : > { %914 = vmatprep.subr.bf16.mxu0 %v913_v32  ;;  %v656_v34 = vpop.permute.xlu0 %655  ;;  %v725_v37 = vld [vmem:[#allocation3 + $0x10] sm:$0xff] }
 0x12e   : > { %v661_v39 = vsel %vm305_vm0, %v656_v34, %v658_v10  ;;  %v915_v40 = vpack.c.bf16 %v725_v37, %v723_v35  ;;  %v730_v42 = vld [vmem:[#allocation3 + $0x38] sm:$0xff] }
 0x12f   : > { %665 = vst [vmem:[#allocation3 + $0x30] sm:$0xf0] %v661_v39  ;;  %v917_v38 = vpack.c.bf16 %v730_v42, %v728_v41 }
 0x130   : > { %v712_v43 = vpop.permute.xlu1 %711  ;;  %916 = vmatpush1.bf16.msra.mxu0 %v915_v40 }
 0x131   : > { %v717_v44 = vsel %vm247_vm2, %v712_v43, %v714_v33  ;;  %918 = vmatprep.subr.bf16.mxu0 %v917_v38  ;;  %v716_v45 = vpop.permute.xlu0 %715 }
 0x132   : > { %721 = vst [vmem:[#allocation3 + $0x40] sm:$0xf] %v717_v44  ;;  %v718_v46 = vsel %vm247_vm2, %v714_v33, %v716_v45  ;;  %v727_v47 = vld [vmem:[#allocation3 + $0x20] sm:$0xff] }
 0x133   : > { %722 = vst [vmem:[#allocation3 + $0x48] sm:$0xf] %v718_v46 }
 0x136   : > { %v729_v48 = vld [vmem:[#allocation3 + $0x30] sm:$0xff] }
 0x137   : > { %v919_v49 = vpack.c.bf16 %v729_v48, %v727_v47 }
 0x139   : > { %920 = vmatpush1.bf16.msra.mxu0 %v919_v49  ;;  %v731_v36 = vld [vmem:[#allocation3 + $0x40] sm:$0xf] }
 0x13a   : > { %v732_v51 = vld [vmem:[#allocation3 + $0x48] sm:$0xf] }
 0x13b   : > { %906 = vmatprep.subr.msk.mxu0 %vm737_vm8, %v732_v51 }
 0x13d   : > { %907 = vmatpush1.msk.msra.mxu0 %vm737_vm8, %v731_v36 }
 0x13e   : > { %908 = vmatmul.mubr.msk.f32.vlgmr.msra.gmra.mrb[0].mxu0 %vm733_vm9, %v225_v52 }
 0x141   : > { %v825_v28 = vpop.permute.xlu1 %824 }
 0x142   : > { %v818_v53 = vpop.permute.xlu0 %817 }
 0x211   : > { %v810_v54 = vpop.f32.mrb[0].mxu0 }
 0x212   : > { %v820_v55 = vmul.f32 %v818_v53, %v810_v54  ;;  %v812_v50 = vpop.f32.mrb[1].mxu0 }
 0x213   : > { %v821_v56 = vmul.f32 %v818_v53, %v812_v50 }
 0x214   : > { %v827_v57 = vadd.f32 %v825_v28, %v820_v55 }
 0x215   : > { %v828_v58 = vadd.f32 %v825_v28, %v821_v56 }
 0x217   : > { %v831_v59 = vcombine.low %v827_v57, %v828_v58 }
 0x219   : > { %833 = vst [vmem:[%s224_s11] sm:$0xff] %v831_v59 }
 0x21a PF: > { %s15_s18 = sadd.s32 1, %s947_s18  }
 0x21b   : > { %p12_p4 = scmp.ge.s32.totalorder %s15_s18, 4  }
 0x21d   :  { %14 = sbr.rel (!%p12_p4) target bundleno = 1 (0x1), region = 78 }

</bundles_post_ra>
